<compile_context>
chip_gen: v7x
topology: tpu7x:2x2x1
jax: 0.10.0
libtpu: 0.0.40
codegen_flags: <defaults>
</compile_context>

<pallas_src>
import jax
import jax.numpy as jnp
from jax.experimental import pallas as pl
from jax.experimental.pallas import tpu as pltpu

LANE = 128      # vreg lane width (last dim)
SUBLANE = 8     # vreg sublane width (second-to-last dim)

_TARGET_TB = 512            # target batch-tile rows (multiple of 8 and 16, and of 256)
_MIN_TB_NO_KTILE = 128      # don't shrink tb below this before resorting to K tiling
_FALLBACK_VMEM_BYTES = 64 * 1024 * 1024   # v7x per-TC VMEM: most conservative default


def _round_up(x, m):
    return ((x + m - 1) // m) * m


def _vmem_limit_bytes():
    """Generation-aware VMEM limit (128 MiB v5e/v6e, 64 MiB per TC on v7x)."""
    try:
        cap = int(pltpu.get_tpu_info().vmem_capacity_bytes)
    except Exception:
        cap = _FALLBACK_VMEM_BYTES
    # 3/4 of physical, capped, with headroom for Mosaic-internal scratch.
    return max(16 * 1024 * 1024, min((cap * 3) // 4, 100 * 1024 * 1024))


def _lane_divisors_desc(dim):
    """Divisors of `dim` that are multiples of LANE, descending (dim % 128 == 0)."""
    return [d for d in range(dim, LANE - 1, -LANE) if dim % d == 0]


def _tb_candidates(B, lo):
    """Batch-tile candidates (descending).  Each is either B itself (a block
    dim equal to the full array dim is always layout-legal) or a multiple of
    SUBLANE; ragged boundary blocks are handled by the pl.cdiv grid."""
    if B <= lo:
        return [B]
    top = B if B <= _TARGET_TB else _TARGET_TB
    cands = [top]
    for t in (256, 128, 64, 32, 16, 8):
        if lo <= t < top:
            cands.append(t)
    return cands


def _block_bytes(eb, tb, to, tk, in_isz, out_isz, has_bias, needs_scratch):
    """Per-grid-step VMEM use: double buffering counted explicitly, output and
    bias blocks at their real itemsize (f32 even under bf16 compute)."""
    xb = eb * tb * tk * in_isz
    wb = eb * tk * to * in_isz
    bb = eb * to * out_isz if has_bias else 0
    ob = eb * tb * to * out_isz
    total = 2 * (xb + wb + bb + ob)
    if needs_scratch:
        total += eb * tb * to * 4        # f32 accumulator scratch (non-f32 outputs)
    return total


def _fuse_ensemble(E, tb, to, tk, B, O_p, fits):
    """Fuse several ensemble members into one grid step when a single member is
    a single block (tiny, step-overhead-bound layer), keeping ge >= 2 whenever
    E >= 2 so v7x's two TensorCores both get work under 'parallel' semantics."""
    single_block = (to == O_p) and (tb >= B)
    if not single_block or E == 1:
        return 1
    for eb in range(E, 0, -1):
        if E % eb:
            continue
        if E // eb < 2 and E >= 2:
            continue
        if fits(eb, tb, to, tk, False):
            return eb
    return 1


def _select_tiling(E, B, I_p, O_p, in_isz, out_isz, has_bias, out_is_f32, budget):
    to_cands = _lane_divisors_desc(O_p)
    tk_cands = _lane_divisors_desc(I_p)

    def fits(eb, tb, to, tk, k_tiled):
        scratch = k_tiled and not out_is_f32
        return _block_bytes(eb, tb, to, tk, in_isz, out_isz, has_bias, scratch) <= budget

    # Phase 1: no K reduction (tk = I_p).  Prefer the largest to (go -> 1 means
    # x is streamed from HBM exactly once), then the largest tb.  All to / tk
    # candidates are 128-multiples; for big layers this naturally yields
    # 256-aligned MXU-friendly tiles on v6e/v7x.
    for to in to_cands:
        for tb in _tb_candidates(B, min(B, _MIN_TB_NO_KTILE)):
            if fits(1, tb, to, I_p, False):
                eb = _fuse_ensemble(E, tb, to, I_p, B, O_p, fits)
                return eb, tb, to, I_p
    # Phase 2: K-tiled accumulation.
    for to in to_cands:
        for tk in tk_cands:
            for tb in _tb_candidates(B, min(B, SUBLANE)):
                if fits(1, tb, to, tk, True):
                    return 1, tb, to, tk
    # Fallback: smallest legal config (tiny relative to any real VMEM limit).
    return 1, min(B, SUBLANE), to_cands[-1], tk_cands[-1]


# ------------------------------ kernels ------------------------------------

def _dot(x, w, squeezed):
    if squeezed:
        return jnp.dot(x, w, preferred_element_type=jnp.float32)
    return jnp.einsum("ebi,eio->ebo", x, w, preferred_element_type=jnp.float32)


def _make_simple_kernel(squeezed, has_bias):
    if has_bias:
        def kernel(x_ref, w_ref, b_ref, o_ref):
            acc = _dot(x_ref[...], w_ref[...], squeezed)
            o_ref[...] = (acc + b_ref[...].astype(jnp.float32)).astype(o_ref.dtype)
    else:
        def kernel(x_ref, w_ref, o_ref):
            o_ref[...] = _dot(x_ref[...], w_ref[...], squeezed).astype(o_ref.dtype)
    return kernel


def _make_ktiled_kernel_f32out(squeezed, has_bias, k_axis):
    # f32 output block doubles as the accumulator (it is revisited across k),
    # so no VMEM scratch and no final acc -> out copy.
    def body(x_ref, w_ref, b_ref, o_ref):
        k = pl.program_id(k_axis)

        @pl.when(k == 0)
        def _init():
            o_ref[...] = jnp.zeros_like(o_ref)

        o_ref[...] += _dot(x_ref[...], w_ref[...], squeezed)

        if has_bias:
            @pl.when(k == pl.num_programs(k_axis) - 1)
            def _finalize():
                o_ref[...] += b_ref[...].astype(o_ref.dtype)

    if has_bias:
        return body
    return lambda x_ref, w_ref, o_ref: body(x_ref, w_ref, None, o_ref)


def _make_ktiled_kernel_scratch(squeezed, has_bias, k_axis):
    # Non-f32 outputs: accumulate in an f32 VMEM scratch instead.
    def body(x_ref, w_ref, b_ref, o_ref, acc_ref):
        k = pl.program_id(k_axis)

        @pl.when(k == 0)
        def _init():
            acc_ref[...] = jnp.zeros_like(acc_ref)

        acc_ref[...] += _dot(x_ref[...], w_ref[...], squeezed)

        @pl.when(k == pl.num_programs(k_axis) - 1)
        def _finalize():
            acc = acc_ref[...]
            if has_bias:
                acc = acc + b_ref[...].astype(jnp.float32)
            o_ref[...] = acc.astype(o_ref.dtype)

    if has_bias:
        return body
    return lambda x_ref, w_ref, o_ref, acc_ref: body(x_ref, w_ref, None, o_ref, acc_ref)


# ------------------------------ wrapper -------------------------------------

def ensemble_linear(x, weight, bias=None, *, compute_dtype=None,
                    block_budget_bytes=None):
    """Pallas implementation of EnsembleLinear.forward.

    x: (E, B, I), weight: (E, I, O), bias: (E, 1, O) or None -> (E, B, O)
    compute_dtype: optionally cast x/weight (e.g. jnp.bfloat16 for the native
    v6e/v7x MXU rate and half the DMA bytes); accumulation stays f32 and the
    output keeps x's original dtype.  Default None = exact module numerics.
    """
    E, B, I = x.shape
    Ew, Iw, O = weight.shape
    assert (Ew, Iw) == (E, I), "weight shape mismatch"
    has_bias = bias is not None
    out_dtype = x.dtype
    out_is_f32 = out_dtype == jnp.float32

    if compute_dtype is not None:
        x = x.astype(compute_dtype)
        weight = weight.astype(compute_dtype)

    # --- lane-dense padding: I and O always to 128-multiples (exact zeros on
    # the contraction / output-feature dims).  B is never padded; raggedness is
    # handled by a cdiv grid with a boundary block. ---
    I_p = _round_up(I, LANE)
    O_p = _round_up(O, LANE)
    if I_p != I:
        x = jnp.pad(x, ((0, 0), (0, 0), (0, I_p - I)))   # contraction needs exact zeros
    if I_p != I or O_p != O:
        weight = jnp.pad(weight, ((0, 0), (0, I_p - I), (0, O_p - O)))
    if has_bias and O_p != O:
        bias = jnp.pad(bias, ((0, 0), (0, 0), (0, O_p - O)))

    in_isz = jnp.dtype(x.dtype).itemsize
    out_isz = jnp.dtype(out_dtype).itemsize

    vmem_limit = _vmem_limit_bytes()
    if block_budget_bytes is None:
        block_budget_bytes = (vmem_limit * 4) // 5

    eb, tb, to, tk = _select_tiling(E, B, I_p, O_p, in_isz, out_isz,
                                    has_bias, out_is_f32, block_budget_bytes)
    ge = E // eb
    go = O_p // to
    gb = pl.cdiv(B, tb)
    gk = I_p // tk
    squeezed = (eb == 1)
    k_tiled = gk > 1

    # Grid-axis order: keep the operand with the larger would-be re-read
    # traffic stationary (its index_map ignores the innermost non-k axis).
    x_bytes = E * B * I_p * in_isz
    w_bytes = E * I_p * O_p * in_isz
    order_ob = (go - 1) * x_bytes <= (gb - 1) * w_bytes   # True -> (e, o, b[, k])

    edim = None if squeezed else eb   # None => ensemble dim squeezed out of blocks

    if not k_tiled:
        if order_ob:
            x_map = lambda e, o, b: (e, b, 0)
            w_map = lambda e, o, b: (e, 0, o)
            b_map = lambda e, o, b: (e, 0, o)
            o_map = lambda e, o, b: (e, b, o)
        else:
            x_map = lambda e, b, o: (e, b, 0)
            w_map = lambda e, b, o: (e, 0, o)
            b_map = lambda e, b, o: (e, 0, o)
            o_map = lambda e, b, o: (e, b, o)
    else:
        if order_ob:
            x_map = lambda e, o, b, k: (e, b, k)
            w_map = lambda e, o, b, k: (e, k, o)
            b_map = lambda e, o, b, k: (e, 0, o)
            o_map = lambda e, o, b, k: (e, b, o)
        else:
            x_map = lambda e, b, o, k: (e, b, k)
            w_map = lambda e, b, o, k: (e, k, o)
            b_map = lambda e, b, o, k: (e, 0, o)
            o_map = lambda e, b, o, k: (e, b, o)

    in_specs = [pl.BlockSpec((edim, tb, tk), x_map),
                pl.BlockSpec((edim, tk, to), w_map)]
    operands = [x, weight]
    if has_bias:
        in_specs.append(pl.BlockSpec((edim, 1, to), b_map))
        operands.append(bias)
    out_spec = pl.BlockSpec((edim, tb, to), o_map)

    grid = (ge, go, gb) if order_ob else (ge, gb, go)
    dim_sem = ["parallel", "parallel", "parallel"]
    scratch_shapes = []
    if k_tiled:
        grid = grid + (gk,)
        dim_sem.append("arbitrary")
        if out_is_f32:
            kernel = _make_ktiled_kernel_f32out(squeezed, has_bias, k_axis=3)
        else:
            kernel = _make_ktiled_kernel_scratch(squeezed, has_bias, k_axis=3)
            scratch_shapes = [pltpu.VMEM((tb, to) if squeezed else (eb, tb, to),
                                         jnp.float32)]
    else:
        kernel = _make_simple_kernel(squeezed, has_bias)

    cost = pl.CostEstimate(
        flops=2 * E * B * I * O,
        bytes_accessed=(x.size * in_isz + weight.size * in_isz
                        + (bias.size * bias.dtype.itemsize if has_bias else 0)
                        + E * B * O_p * out_isz),
        transcendentals=0,
    )

    out = pl.pallas_call(
        kernel,
        out_shape=jax.ShapeDtypeStruct((E, B, O_p), out_dtype),
        grid_spec=pltpu.PrefetchScalarGridSpec(
            num_scalar_prefetch=0,
            grid=grid,
            in_specs=in_specs,
            out_specs=out_spec,
            scratch_shapes=scratch_shapes,
        ),
        compiler_params=pltpu.CompilerParams(
            dimension_semantics=tuple(dim_sem),
            vmem_limit_bytes=vmem_limit,
        ),
        cost_estimate=cost,
    )(*operands)

    if O_p != O:
        out = out[:, :, :O]
    return out


def init_ensemble_linear_params(key, ensemble_size, in_feature, out_feature, bias=True):
    """Deterministic init matching the PyTorch module: U(-k, k), k = sqrt(1/in_feature)."""
    k = jnp.sqrt(1.0 / in_feature)
    wkey, bkey = jax.random.split(key)
    weight = jax.random.uniform(
        wkey, (ensemble_size, in_feature, out_feature),
        dtype=jnp.float32, minval=-k, maxval=k)
    if bias:
        b = jax.random.uniform(
            bkey, (ensemble_size, 1, out_feature),
            dtype=jnp.float32, minval=-k, maxval=k)
    else:
        b = None
    return weight, b


if __name__ == "__main__":
    key = jax.random.PRNGKey(0)

    # Case 1: small ensemble layer with bias (members fused -> batched-dot kernel).
    E, B, I, O = 4, 8, 32, 16
    k1, k2, key = jax.random.split(key, 3)
    weight, bias = init_ensemble_linear_params(k1, E, I, O, bias=True)
    x = jax.random.normal(k2, (E, B, I), dtype=jnp.float32)
    out = jax.block_until_ready(ensemble_linear(x, weight, bias))
    ref = jnp.matmul(x, weight) + bias
    assert out.shape == (E, B, O)
    assert jnp.allclose(out, ref, atol=1e-5, rtol=1e-5), "case 1 mismatch"

    # Case 2: no bias, ragged shapes (squeezed-ensemble 2-D dot, no-bias kernel).
    E2, B2, I2, O2 = 3, 5, 20, 10
    k1, k2, key = jax.random.split(key, 3)
    w2, _ = init_ensemble_linear_params(k1, E2, I2, O2, bias=False)
    x2 = jax.random.normal(k2, (E2, B2, I2), dtype=jnp.float32)
    out2 = jax.block_until_ready(ensemble_linear(x2, w2, None))
    ref2 = jnp.matmul(x2, w2)
    assert out2.shape == (E2, B2, O2)
    assert jnp.allclose(out2, ref2, atol=1e-5, rtol=1e-5), "case 2 mismatch"

    # Case 3: force the K-tiled path (f32 output block used as the accumulator)
    # with an artificially tiny block budget.
    E3, B3, I3, O3 = 2, 16, 256, 256
    k1, k2, key = jax.random.split(key, 3)
    w3, b3 = init_ensemble_linear_params(k1, E3, I3, O3, bias=True)
    x3 = jax.random.normal(k2, (E3, B3, I3), dtype=jnp.float32)
    out3 = jax.block_until_ready(
        ensemble_linear(x3, w3, b3, block_budget_bytes=64 * 1024))
    ref3 = jnp.matmul(x3, w3) + b3
    assert jnp.allclose(out3, ref3, atol=1e-4, rtol=1e-4), "case 3 mismatch"

    # Case 4: bf16 MXU path (v6e/v7x-friendly), f32 accumulation, looser tolerance.
    out4 = jax.block_until_ready(
        ensemble_linear(x, weight, bias, compute_dtype=jnp.bfloat16))
    assert jnp.allclose(out4, ref, atol=5e-2, rtol=5e-2), "case 4 mismatch"

    # Case 5: O > 128 and not a 128-multiple (exercises unconditional O padding
    # + lane-dense stores + slice-back), ragged B and I padding.
    E5, B5, I5, O5 = 2, 7, 40, 200
    k1, k2, key = jax.random.split(key, 3)
    w5, b5 = init_ensemble_linear_params(k1, E5, I5, O5, bias=True)
    x5 = jax.random.normal(k2, (E5, B5, I5), dtype=jnp.float32)
    out5 = jax.block_until_ready(ensemble_linear(x5, w5, b5))
    ref5 = jnp.matmul(x5, w5) + b5
    assert out5.shape == (E5, B5, O5)
    assert jnp.allclose(out5, ref5, atol=1e-5, rtol=1e-5), "case 5 mismatch"

    print("KERNEL_OK")
</pallas_src>

<mosaic_0001>
module attributes {stable_mosaic.version = 11 : i64} {
  func.func @kernel(%arg0: i32, %arg1: i32, %arg2: i32, %arg3: memref<2x8x128xf32, #tpu.memory_space<vmem>>, %arg4: memref<2x128x128xf32, #tpu.memory_space<vmem>>, %arg5: memref<2x1x128xf32, #tpu.memory_space<vmem>>, %arg6: memref<2x8x128xf32, #tpu.memory_space<vmem>>) attributes {dimension_semantics = [#tpu.dimension_semantics<parallel>, #tpu.dimension_semantics<parallel>, #tpu.dimension_semantics<parallel>], iteration_bounds = array<i64: 2, 1, 1>, scalar_prefetch = 0 : i64, scratch_operands = 0 : i64, tpu.core_type = #tpu.core_type<tc>, window_params = [{transform_indices = @transform_0, window_bounds = array<i64: 2, 8, 128>}, {transform_indices = @transform_1, window_bounds = array<i64: 2, 128, 128>}, {transform_indices = @transform_2, window_bounds = array<i64: 2, 1, 128>}, {transform_indices = @transform_3, window_bounds = array<i64: 2, 8, 128>}]} {
    %c0 = arith.constant 0 : index
    %c0_0 = arith.constant 0 : index
    %c0_1 = arith.constant 0 : index
    %0 = vector.load %arg3[%c0, %c0_0, %c0_1] : memref<2x8x128xf32, #tpu.memory_space<vmem>>, vector<2x8x128xf32>
    %c0_2 = arith.constant 0 : index
    %c0_3 = arith.constant 0 : index
    %c0_4 = arith.constant 0 : index
    %1 = vector.load %arg4[%c0_2, %c0_3, %c0_4] : memref<2x128x128xf32, #tpu.memory_space<vmem>>, vector<2x128x128xf32>
    "tpu.trace_start"() <{level = 10 : i32, message = "ebi,eio->ebo"}> : () -> ()
    %cst = arith.constant dense<0.000000e+00> : vector<2x8x128xf32>
    %2 = tpu.matmul %0, %1, %cst {dimension_numbers = #tpu.dot_dimension_numbers<[2], [1], [1], [2], [0, 0, 0, 1, 1, 2], [0], [0]>} : vector<2x8x128xf32>, vector<2x128x128xf32>, vector<2x8x128xf32> -> vector<2x8x128xf32>
    "tpu.trace_stop"() : () -> ()
    %c0_5 = arith.constant 0 : index
    %c0_6 = arith.constant 0 : index
    %c0_7 = arith.constant 0 : index
    %3 = vector.load %arg5[%c0_5, %c0_6, %c0_7] : memref<2x1x128xf32, #tpu.memory_space<vmem>>, vector<2x1x128xf32>
    %4 = vector.broadcast %3 : vector<2x1x128xf32> to vector<2x8x128xf32>
    %5 = arith.addf %2, %4 : vector<2x8x128xf32>
    %c0_8 = arith.constant 0 : index
    %c0_9 = arith.constant 0 : index
    %c0_10 = arith.constant 0 : index
    %6 = vector.load %arg6[%c0_8, %c0_9, %c0_10] : memref<2x8x128xf32, #tpu.memory_space<vmem>>, vector<2x8x128xf32>
    tpu.vector_store %arg6[%c0_8, %c0_9, %c0_10], %5 {strides = array<i32>} : memref<2x8x128xf32, #tpu.memory_space<vmem>>, vector<2x8x128xf32>,
    return
  }
  func.func @transform_0(%arg0: i32, %arg1: i32, %arg2: i32) -> (i32, i32, i32) {
    %c0_i32 = arith.constant 0 : i32
    %c0_i32_0 = arith.constant 0 : i32
    return %arg0, %arg2, %c0_i32 : i32, i32, i32
  }
  func.func @transform_1(%arg0: i32, %arg1: i32, %arg2: i32) -> (i32, i32, i32) {
    %c0_i32 = arith.constant 0 : i32
    %c0_i32_0 = arith.constant 0 : i32
    return %arg0, %c0_i32, %arg1 : i32, i32, i32
  }
  func.func @transform_2(%arg0: i32, %arg1: i32, %arg2: i32) -> (i32, i32, i32) {
    %c0_i32 = arith.constant 0 : i32
    %c0_i32_0 = arith.constant 0 : i32
    return %arg0, %c0_i32, %arg1 : i32, i32, i32
  }
  func.func @transform_3(%arg0: i32, %arg1: i32, %arg2: i32) -> (i32, i32, i32) {
    %c0_i32 = arith.constant 0 : i32
    return %arg0, %arg2, %arg1 : i32, i32, i32
  }
}

</mosaic_0001>

<bundles_post_ra>
// kernel: tpu_custom_call.1
= control target key start
LH: loop header
LB: loop body
LE: loop exit
PB: predicated region body
PF: predicated region fallthrough
CT: control target
= control target key end

     0   :  { %8 = vsyncpa [#allocation3], 0  ;;  %s1348_s0 = inlined_call_operand.hbm [shape: f32[4,8,128], index: 0, kind: input, shape index: {}]   ;;  %s1349_s1 = inlined_call_operand.hbm [shape: f32[4,128,128], index: 1, kind: input, shape index: {}]   ;;  %s1350_s2 = inlined_call_operand.vmem [shape: f32[4,1,128], index: 2, kind: input, shape index: {}]   ;;  %s1351_s3 = inlined_call_operand.hbm [shape: f32[4,8,128], index: 3, kind: output, shape index: {}]  }
   0x1   :  { %10 = vsyncpa [#allocation3 + $0x1], 0 }
   0x2   :  { %11 = vsyncpa [#allocation6], 0 }
   0x3   :  { %13 = vsyncpa [#allocation6 + $0x1], 0 }
   0x4   :  { %14 = vsyncpa [#allocation4], 0 }
   0x5   :  { %16 = vsyncpa [#allocation4 + $0x1], 0  ;;  %s1055_s12 = smov 0   ;;  %s1057_s13 = smov 0  }
   0x6   :  { %s1059_s14 = smov 0   ;;  %s1061_s15 = smov 0  }
   0x7   :  { %s1063_s16 = smov 0   ;;  %s1065_s17 = smov 0  }
   0x8 LB: > { %s624_s18 = sadd.s32 4294967295, %s1023_s17   ;;  %s625_s19 = sadd.s32 4294967294, %s1023_s17   ;;  %s1023_s17 = sphi %s1065_s17, %s22_s17   ;;  %s1019_s16 = sphi %s1063_s16, %s1369_s16   ;;  %s1015_s15 = sphi %s1061_s15, %s1368_s15   ;;  %s1011_s14 = sphi %s1059_s14, %s1367_s14   ;;  %s1007_s13 = sphi %s1057_s13, %s1366_s13   ;;  %s1003_s12 = sphi %s1055_s12, %s1365_s12  }
   0x9   : > { %s41_s20 = sadd.s32 1, %s1019_s16  ;;  %s50_s21 = sadd.s32 1, %s1011_s14 }
   0xa   : > { %p43_p0 = scmp.ge.s32.totalorder %s41_s20, 2  ;;  %p57_p1 = scmp.ne.s32.totalorder %s1011_s14, %s1007_s13 }
   0xb   : > { %p58_p2 = scmp.eq.s32.totalorder %s1023_s17, 0  ;;  %p63_p3 = scmp.ne.s32.totalorder %s1007_s13, %s1003_s12 }
   0xc   : > { %s1371_s20 = smov (%p43_p0, %s41_s20), 0  ;;  %p64_p5 = scmp.eq.s32.totalorder %s624_s18, 0 }
   0xd   : > { %p1096_p4 = por %p58_p2, %p57_p1  ;;  %s45_s23 = ssub.s32 %s1019_s16, %s1371_s20 }
   0xe   : > { %p147_p6 = scmp.eq.s32.totalorder %s624_s18, 1  ;;  %p48_p7 = scmp.eq.s32.totalorder %s45_s23, 0 }
   0xf   : > { %p1102_p8 = por %p64_p5, %p63_p3  ;;  %p153_p10 = scmp.eq.s32.totalorder %s625_s19, 1 }
  0x10   : > { %p1106_p9 = por %p147_p6, %p57_p1  ;;  %p820_p13 = scmp.lt.s32.totalorder %s1023_s17, 2 }
  0x11   : > { %s1355_s24 = scalar_select %p1102_p8, 1, 0 }
  0x12   : > { %s1356_s25 = scalar_select %p1106_p9, 1, 0 }
  0x13   : > { %s1111_s26 = scalar_select %p48_p7, %s1011_s14, %s50_s21  }
  0x14   : > { %p1113_p11 = por %p153_p10, %p63_p3  ;;  %s1120_s28 = sand.u32 1, %s1011_s14  }
  0x15   : > { %s628_s29 = sshll.u32 %s1120_s28, 4  ;;  %s647_s30 = sshll.u32 %s1019_s16, 8 }
  0x16   : > { %s1357_s27 = scalar_select %p1113_p11, 1, 0 }
  0x17   : > { %s1127_s6 = scalar_lea.hbm %s1348_s0, %s647_s30  ;;  %s177_s7 = scalar_lea.vmem [#allocation2], %s628_s29 }
  0x18   : > { %s185_s8 = sshll.u32 %s177_s7, 4  ;;  %p1133_p0 = pnand %p820_p13, %p1096_p4  ;;  %s1129_s8 = int_to_ptr.vmem [resolvable:$true] %s185_s8 }
  0x19   : > { %s174_s10 = scalar_lea.sflag [#allocation3], %s1120_s28  ;;  %s877_s11 = scalar_lea.hbm %s1127_s6, 256 }
  0x1a   : > { %p878_p2 = scmp.ne.s32.totalorder %s1127_s6, %s877_s11  ;;  %p879_p3 = pneg %p1133_p0 }
  0x1b   : > { %s882_s21 = scalar_lea.hbm %s1348_s0, 512  ;;  %p883_p4 = scmp.lt.u32.totalorder %s1127_s6, %s1348_s0 }
  0x1c   : > { %p880_p5 = pnand %p879_p3, %p878_p2  ;;  %p884_p7 = scmp.lt.u32.totalorder %s882_s21, %s877_s11 }
  0x1d   : > { %p886_p13 = scmp.lt.u32.totalorder %s877_s11, %s1127_s6 }
  0x1e   : > { %p881_p6 = pneg %p880_p5  ;;  %p885_p10 = por %p884_p7, %p883_p4 }
  0x20   : > { %p887_p12 = por %p886_p13, %p885_p10 }
  0x22   : > { %p888_p1 = pnand %p887_p12, %p881_p6 }
  0x24   : > { %891 = shalt.err (!%p888_p1)
}
  0x25   : > { %s892_s29 = scalar_lea.vmem %s1129_s8, 256  ;;  %s1025_s30 = smov [#allocation2]  }
  0x26   : > { %p893_p2 = scmp.ne.s32.totalorder %s1129_s8, %s892_s29  ;;  %s897_s4 = sshll.u32 %s1025_s30, 4  ;;  %s898_s4 = int_to_ptr.vmem [resolvable:$false] %s897_s4 }
  0x27   : > { %s899_s5 = scalar_lea.vmem %s898_s4, 512  ;;  %p900_p9 = scmp.lt.s32.totalorder %s1129_s8, %s898_s4 }
  0x28   : > { %p895_p5 = pnand %p893_p2, %p879_p3  ;;  %p901_p4 = scmp.lt.s32.totalorder %s899_s5, %s892_s29 }
  0x2a   : > { %p896_p11 = pneg %p895_p5  ;;  %p902_p7 = por %p901_p4, %p900_p9 }
  0x2c   : > { %p903_p10 = pnand %p902_p7, %p896_p11 }
  0x2e   : > { %906 = shalt.err (!%p903_p10)
}
  0x2f   : > { %s1026_s7 = smov 128   ;;  %s1027_s11 = smov 8  }
  0x30   : > { %812 = dma.hbm_to_vmem [thread:$0]  (!%p1133_p0), %s1127_s6, 256, %s1129_s8, %s174_s10, %s1026_s7, %s1026_s7, %s1027_s11  }
  0x31   : > { %p227_p9 = scmp.lt.s32.totalorder %s1023_s17, 3  ;;  %s631_s18 = sshll.u32 %s1120_s28, 8 }
  0x32   : > { %s649_s19 = sshll.u32 %s1019_s16, 12  ;;  %p1359_p11 = scmp.ge.s32.totalorder %s1023_s17, 1 }
  0x33   : > { %s1181_s29 = scalar_lea.hbm %s1349_s1, %s649_s19  ;;  %s199_s30 = scalar_lea.vmem [#allocation5], %s631_s18 }
  0x34   : > { %p1174_p12 = pnand %p1359_p11, %p227_p9  ;;  %s208_s4 = sshll.u32 %s199_s30, 4  ;;  %s1183_s4 = int_to_ptr.vmem [resolvable:$true] %s208_s4 }
  0x35   : > { %s196_s6 = scalar_lea.sflag [#allocation6], %s1120_s28  ;;  %s907_s8 = scalar_lea.hbm %s1181_s29, 4096 }
  0x36   : > { %p908_p1 = scmp.ne.s32.totalorder %s1181_s29, %s907_s8  ;;  %s912_s19 = scalar_lea.hbm %s1349_s1, 8192 }
  0x37   : > { %p913_p2 = scmp.lt.u32.totalorder %s1181_s29, %s1349_s1  ;;  %p914_p5 = scmp.lt.u32.totalorder %s912_s19, %s907_s8 }
  0x38   : > { %p910_p6 = pnand %p908_p1, %p879_p3  ;;  %p916_p7 = scmp.lt.u32.totalorder %s907_s8, %s1181_s29 }
  0x39   : > { %p915_p4 = por %p914_p5, %p913_p2 }
  0x3a   : > { %p911_p13 = pneg %p910_p6 }
  0x3b   : > { %p917_p10 = por %p916_p7, %p915_p4 }
  0x3d   : > { %p918_p9 = pnand %p917_p10, %p911_p13 }
  0x3f   : > { %921 = shalt.err (!%p918_p9)
}
  0x40   : > { %s922_s18 = scalar_lea.vmem %s1183_s4, 4096  ;;  %s1028_s30 = smov [#allocation5]  }
  0x41   : > { %p923_p11 = scmp.ne.s32.totalorder %s1183_s4, %s922_s18  ;;  %s927_s10 = sshll.u32 %s1028_s30, 4  ;;  %s928_s10 = int_to_ptr.vmem [resolvable:$false] %s927_s10 }
  0x42   : > { %s929_s5 = scalar_lea.vmem %s928_s10, 8192  ;;  %p930_p8 = scmp.lt.s32.totalorder %s1183_s4, %s928_s10 }
  0x43   : > { %p925_p1 = pnand %p923_p11, %p879_p3  ;;  %p931_p2 = scmp.lt.s32.totalorder %s929_s5, %s922_s18 }
  0x45   : > { %p926_p6 = pneg %p925_p1  ;;  %p932_p5 = por %p931_p2, %p930_p8 }
  0x47   : > { %p933_p4 = pnand %p932_p5, %p926_p6 }
  0x49   : > { %936 = shalt.err (!%p933_p4)
}
  0x4a   : > { %815 = dma.hbm_to_vmem [thread:$0]  (!%p1133_p0), %s1181_s29, 4096, %s1183_s4, %s196_s6, %s1026_s7, %s1026_s7, %s1027_s11  }
  0x4b   : > { %231 = sbr.rel (%p1174_p12) target bundleno = 350 (0x15e), region = 32  ;;  %s1217_s8 = sand.u32 (!%p1174_p12), 1, %s1007_s13  }
  0x4c   : > { %s636_s19 = sshll.u32 (!%p1174_p12), %s1217_s8, 4  ;;  %s234_s9 = scalar_lea.sflag (!%p1174_p12), [#allocation3], %s1217_s8 }
  0x4d   : > { %s1223_s22 = scalar_lea.vmem (!%p1174_p12), [#allocation2], %s636_s19  ;;  %p1361_p8 = scmp.ne.s32.totalorder (!%p1174_p12), %s1355_s24, 0 }
  0x52   : > { %990 = dma.done.wait (%p1361_p8), %s234_s9, 256  }
  0x53   : > { %992 = vsyncadd (%p1361_p8), %s234_s9, 4294967040  ;;  %s637_s28 = sshll.u32 %s1217_s8, 8  ;;  %s243_s7 = scalar_lea.sflag [#allocation6], %s1217_s8 }
  0x54   : > { %s1231_s11 = scalar_lea.vmem [#allocation5], %s637_s28 }
  0x55   : > { %994 = dma.done.wait (%p1361_p8), %s243_s7, 4096  }
  0x56   : > { %996 = vsyncadd (%p1361_p8), %s243_s7, 4294963200  ;;  %v1029_v0 = vmov 0.0|0.0   ;;  %vm1030_vm0 = vmmov 0   ;;  %v1031_v1 = vmov 0.0   ;;  %v294_v2 = vld [vmem:[%s1231_s11] sm:$0xff]  ;;  %v295_v3 = vld [vmem:[%s1231_s11 + $0x8] sm:$0xff] }
  0x57   : > { %755 = vmatprep.subr.bf16.mxu0 %v1029_v0  ;;  %779 = vmatprep.subr.bf16.mxu1 %v1029_v0  ;;  %v310_v4 = vld [vmem:[%s1231_s11 + $0x80] sm:$0xff]  ;;  %v756_v5 = vpack.c.bf16 %v295_v3, %v294_v2  ;;  %v311_v6 = vld [vmem:[%s1231_s11 + $0x88] sm:$0xff]  ;;  %v296_v7 = vld [vmem:[%s1231_s11 + $0x10] sm:$0xff]  ;;  %s639_s24 = sshll.u32 %s1015_s15, 1  ;;  %s280_s6 = scalar_lea.vmem [#allocation7], %s636_s19 }
  0x58   : > { %717 = vmatprep.mubr.msk.f32.mxu0 %vm1030_vm0, %v1031_v1  ;;  %752 = vmatprep.mubr.msk.f32.mxu1 %vm1030_vm0, %v1031_v1  ;;  %v297_v8 = vld [vmem:[%s1231_s11 + $0x18] sm:$0xff]  ;;  %v780_v9 = vpack.c.bf16 %v311_v6, %v310_v4  ;;  %v312_v10 = vld [vmem:[%s1231_s11 + $0x90] sm:$0xff]  ;;  %v298_v14 = vld [vmem:[%s1231_s11 + $0x20] sm:$0xff]  ;;  %p284_p0 = scmp.lt.s32.totalorder %s639_s24, 3  ;;  %s498_s23 = sshll.u32 %s280_s6, 4  ;;  %s1294_s23 = int_to_ptr.vmem [resolvable:$true] %s498_s23 }
  0x59   : > { %v313_v11 = vld [vmem:[%s1231_s11 + $0x98] sm:$0xff]  ;;  %757 = vmatpush3.bf16.msra.mxu0 %v756_v5  ;;  %v759_v12 = vpack.c.bf16 %v297_v8, %v296_v7  ;;  %v299_v15 = vld [vmem:[%s1231_s11 + $0x28] sm:$0xff]  ;;  %v314_v16 = vld [vmem:[%s1231_s11 + $0xa0] sm:$0xff]  ;;  %s650_s18 = sshll.u32 %s1015_s15, 8  ;;  %s483_s15 = scalar_lea.sflag [#allocation4], %s1217_s8 }
  0x5a   : > { %781 = vmatpush3.bf16.msra.mxu1 %v780_v9  ;;  %758 = vmatprep.subr.bf16.mxu0 %v1029_v0  ;;  %v783_v13 = vpack.c.bf16 %v313_v11, %v312_v10  ;;  %v315_v17 = vld [vmem:[%s1231_s11 + $0xa8] sm:$0xff]  ;;  %v762_v18 = vpack.c.bf16 %v299_v15, %v298_v14  ;;  %v300_v20 = vld [vmem:[%s1231_s11 + $0x30] sm:$0xff]  ;;  %v301_v21 = vld [vmem:[%s1231_s11 + $0x38] sm:$0xff]  ;;  %s1373_s24 = smov (!%p284_p0, %s639_s24), 3  ;;  %s1299_s5 = scalar_lea.hbm %s1351_s3, %s650_s18 }
  0x5b   : > { %782 = vmatprep.subr.bf16.mxu1 %v1029_v0  ;;  %v786_v19 = vpack.c.bf16 %v315_v17, %v314_v16  ;;  %v316_v22 = vld [vmem:[%s1231_s11 + $0xb0] sm:$0xff]  ;;  %v317_v23 = vld [vmem:[%s1231_s11 + $0xb8] sm:$0xff]  ;;  %v765_v24 = vpack.c.bf16 %v301_v21, %v300_v20  ;;  %v302_v26 = vld [vmem:[%s1231_s11 + $0x40] sm:$0xff]  ;;  %s289_s4 = scalar_lea.vmem %s1350_s2, %s1373_s24  ;;  %s937_s19 = scalar_lea.vmem %s1294_s23, 256 }
  0x5c   : > { %v789_v25 = vpack.c.bf16 %v317_v23, %v316_v22  ;;  %v303_v27 = vld [vmem:[%s1231_s11 + $0x48] sm:$0xff]  ;;  %v318_v28 = vld [vmem:[%s1231_s11 + $0xc0] sm:$0xff]  ;;  %v304_v32 = vld [vmem:[%s1231_s11 + $0x50] sm:$0xff]  ;;  %p938_p3 = scmp.ne.s32.totalorder %s1294_s23, %s937_s19  ;;  %p1362_p12 = scmp.ne.s32.totalorder %s1356_s25, 0 }
  0x5d   : > { %760 = vmatpush3.bf16.msra.mxu0 %v759_v12  ;;  %v319_v29 = vld [vmem:[%s1231_s11 + $0xc8] sm:$0xff]  ;;  %v768_v30 = vpack.c.bf16 %v303_v27, %v302_v26  ;;  %v305_v33 = vld [vmem:[%s1231_s11 + $0x58] sm:$0xff]  ;;  %v320_v34 = vld [vmem:[%s1231_s11 + $0xd0] sm:$0xff]  ;;  %s1032_s9 = smov [#allocation7]  }
  0x5e   : > { %784 = vmatpush3.bf16.msra.mxu1 %v783_v13  ;;  %761 = vmatprep.subr.bf16.mxu0 %v1029_v0  ;;  %v792_v31 = vpack.c.bf16 %v319_v29, %v318_v28  ;;  %v321_v35 = vld [vmem:[%s1231_s11 + $0xd8] sm:$0xff]  ;;  %v771_v36 = vpack.c.bf16 %v305_v33, %v304_v32  ;;  %v306_v38 = vld [vmem:[%s1231_s11 + $0x60] sm:$0xff]  ;;  %v307_v39 = vld [vmem:[%s1231_s11 + $0x68] sm:$0xff]  ;;  %p939_p13 = pnand %p938_p3, %p1362_p12 }
  0x5f   : > { %785 = vmatprep.subr.bf16.mxu1 %v1029_v0  ;;  %v795_v37 = vpack.c.bf16 %v321_v35, %v320_v34  ;;  %v322_v40 = vld [vmem:[%s1231_s11 + $0xe0] sm:$0xff]  ;;  %v323_v41 = vld [vmem:[%s1231_s11 + $0xe8] sm:$0xff]  ;;  %v774_v42 = vpack.c.bf16 %v307_v39, %v306_v38  ;;  %v308_v44 = vld [vmem:[%s1231_s11 + $0x70] sm:$0xff] }
  0x60   : > { %v798_v43 = vpack.c.bf16 %v323_v41, %v322_v40  ;;  %v309_v45 = vld [vmem:[%s1231_s11 + $0x78] sm:$0xff]  ;;  %v324_v46 = vld [vmem:[%s1231_s11 + $0xf0] sm:$0xff]  ;;  %v640_v52 = vld [vmem:[%s289_s4] ss:$0 sm:$0xff]  ;;  %p940_p7 = pneg %p939_p13 }
  0x61   : > { %763 = vmatpush3.bf16.msra.mxu0 %v762_v18  ;;  %v325_v47 = vld [vmem:[%s1231_s11 + $0xf8] sm:$0xff]  ;;  %v777_v48 = vpack.c.bf16 %v309_v45, %v308_v44  ;;  %v292_v50 = vld [vmem:[%s1223_s22] sm:$0xff] }
  0x62   : > { %787 = vmatpush3.bf16.msra.mxu1 %v786_v19  ;;  %764 = vmatprep.subr.bf16.mxu0 %v1029_v0  ;;  %v801_v49 = vpack.c.bf16 %v325_v47, %v324_v46  ;;  %v293_v51 = vld [vmem:[%s1223_s22 + $0x8] sm:$0xff]  ;;  %v641_v53 = vld [vmem:[%s289_s4 + $0x1] ss:$0 sm:$0xff]  ;;  %s941_s22 = sshll.u32 %s1032_s9, 4  ;;  %s942_s22 = int_to_ptr.vmem [resolvable:$false] %s941_s22 }
  0x63   : > { %788 = vmatprep.subr.bf16.mxu1 %v1029_v0  ;;  %s943_s28 = scalar_lea.vmem %s942_s22, 512  ;;  %p944_p10 = scmp.lt.s32.totalorder %s1294_s23, %s942_s22 }
  0x64   : > { %p945_p9 = scmp.lt.s32.totalorder %s943_s28, %s937_s19 }
  0x65   : > { %766 = vmatpush3.bf16.msra.mxu0 %v765_v24 }
  0x66   : > { %790 = vmatpush3.bf16.msra.mxu1 %v789_v25  ;;  %767 = vmatprep.subr.bf16.mxu0 %v1029_v0  ;;  %p946_p11 = por %p945_p9, %p944_p10 }
  0x67   : > { %791 = vmatprep.subr.bf16.mxu1 %v1029_v0 }
  0x68   : > { %p947_p1 = pnand %p946_p11, %p940_p7 }
  0x69   : > { %769 = vmatpush3.bf16.msra.mxu0 %v768_v30 }
  0x6a   : > { %793 = vmatpush3.bf16.msra.mxu1 %v792_v31  ;;  %770 = vmatprep.subr.bf16.mxu0 %v1029_v0 }
  0x6b   : > { %794 = vmatprep.subr.bf16.mxu1 %v1029_v0 }
  0x6d   : > { %772 = vmatpush3.bf16.msra.mxu0 %v771_v36 }
  0x6e   : > { %796 = vmatpush3.bf16.msra.mxu1 %v795_v37  ;;  %773 = vmatprep.subr.bf16.mxu0 %v1029_v0 }
  0x6f   : > { %797 = vmatprep.subr.bf16.mxu1 %v1029_v0 }
  0x71   : > { %775 = vmatpush3.bf16.msra.mxu0 %v774_v42 }
  0x72   : > { %799 = vmatpush3.bf16.msra.mxu1 %v798_v43  ;;  %776 = vmatprep.subr.bf16.mxu0 %v1029_v0 }
  0x73   : > { %800 = vmatprep.subr.bf16.mxu1 %v1029_v0 }
  0x75   : > { %778 = vmatpush3.bf16.msra.mxu0 %v777_v48 }
  0x76   : > { %802 = vmatpush3.bf16.msra.mxu1 %v801_v49 }
  0x78   : > { %718 = vmatmul.mubr.f32.vlgmr.msra.gmra.mrb[0].mxu0 %v292_v50 }
  0x79   : > { %753 = vmatmul.mubr.f32.vlgmr.msra.gmra.mrb[0].mxu1 %v293_v51 }
 0x14b   : > { %v406_v54 = vpop.f32.mrb[0].mxu0 }
 0x14c   : > { %v407_v55 = vadd.f32 %v640_v52, %v406_v54  ;;  %v476_v56 = vpop.f32.mrb[0].mxu1  ;;  %v719_v57 = vpop.f32.mrb[1].mxu0 }
 0x14d   : > { %v477_v58 = vadd.f32 %v641_v53, %v476_v56  ;;  %v754_v59 = vpop.f32.mrb[1].mxu1 }
 0x14e   : > { %480 = vst [vmem:[%s280_s6] sm:$0xff] %v407_v55 }
 0x14f   : > { %481 = vst [vmem:[%s280_s6 + $0x8] sm:$0xff] %v477_v58 }
 0x150   : > { %950 = shalt.err (!%p947_p1)
}
 0x151   : > { %s951_s7 = scalar_lea.hbm %s1299_s5, 256  ;;  %s955_s21 = scalar_lea.hbm %s1351_s3, 512 }
 0x152   : > { %p952_p6 = scmp.ne.s32.totalorder %s1299_s5, %s951_s7  ;;  %p956_p4 = scmp.lt.u32.totalorder %s1299_s5, %s1351_s3 }
 0x153   : > { %p957_p8 = scmp.lt.u32.totalorder %s955_s21, %s951_s7  ;;  %p959_p3 = scmp.lt.u32.totalorder %s951_s7, %s1299_s5 }
 0x154   : > { %p953_p2 = pnand %p952_p6, %p1362_p12 }
 0x155   : > { %p958_p0 = por %p957_p8, %p956_p4 }
 0x156   : > { %p954_p5 = pneg %p953_p2 }
 0x157   : > { %p960_p13 = por %p959_p3, %p958_p0 }
 0x159   : > { %p961_p7 = pnand %p960_p13, %p954_p5 }
 0x15b   : > { %964 = shalt.err (!%p961_p7)
}
 0x15c   : > { %s1033_s6 = smov 128   ;;  %s1034_s18 = smov 8  }
 0x15d   : > { %807 = dma.vmem_to_hbm [thread:$0]  (%p1362_p12), %s1294_s23, 256, %s1299_s5, %s483_s15, %s1033_s6, %s1033_s6, %s1034_s18  }
 0x15e PF: > { %s513_s30 = sand.u32 1, %s1003_s12   ;;  %p1363_p10 = scmp.ne.s32.totalorder %s1357_s27, 0 }
 0x15f   : > { %p1364_p9 = scmp.ge.s32.totalorder %s1023_s17, 2  ;;  %s514_s10 = scalar_lea.sflag [#allocation4], %s513_s30 }
 0x161   : > { %p817_p11 = pnand %p1364_p9, %p1363_p10 }
 0x163   : > { %998 = dma.done.wait (!%p817_p11), %s514_s10, 256  }
 0x164   : > { %1000 = vsyncadd (!%p817_p11), %s514_s10, 4294967040  ;;  %s22_s17 = sadd.s32 1, %s1023_s17   ;;  %s1365_s12 = smov %s1007_s13 }
 0x165   : > { %p19_p1 = scmp.ge.s32.totalorder %s22_s17, 4   ;;  %s1366_s13 = smov %s1011_s14 }
 0x166   : > { %s1367_s14 = smov %s1111_s26  ;;  %s1368_s15 = smov %s1019_s16 }
 0x167   : > { %s1369_s16 = smov %s1371_s20  ;;  %21 = sbr.rel (!%p19_p1) target bundleno = 8 (0x8), region = 93 }
 0x16e   :  { %519 = vsyncpa [#allocation3], 1 }
 0x16f   :  { %521 = vsyncpa [#allocation3 + $0x1], 1 }
 0x170   :  { %522 = vsyncpa [#allocation6], 1 }
 0x171   :  { %524 = vsyncpa [#allocation6 + $0x1], 1 }
 0x172   :  { %525 = vsyncpa [#allocation4], 1 }
 0x173   :  { %527 = vsyncpa [#allocation4 + $0x1], 1 }

</bundles_post_ra>
